<compile_context>
chip_gen: v5e
topology: v5e:2x2
jax: 0.10.0
libtpu: 0.0.40
codegen_flags: <defaults>
</compile_context>

<pallas_src>
import functools

import jax
import jax.numpy as jnp
from jax import lax
from jax.experimental import pallas as pl
from jax.experimental.pallas import tpu as pltpu

_BLOCK_BUDGET_BYTES = 2 * 1024 * 1024  # per-input VMEM block target (v7x-safe)


def _cdiv(a, b):
    return -(-a // b)


def _round_up(x, m):
    return ((x + m - 1) // m) * m


def _round_down(x, m):
    return (x // m) * m


def _dice_kernel(x_ref, t_ref, o_ref, acc_xt_ref, acc_s_ref, *,
                 tile_d, d_total, ragged):
    # x_ref, t_ref: (S, TILE_D) blocks of S samples' flattened features.
    # o_ref:        (S, 1) per-sample dice ratio (written at the last k step).
    # acc_*_ref:    (S, 1) f32 accumulators carried across the feature axis.
    k = pl.program_id(1)
    nk = pl.num_programs(1)

    x = x_ref[...].astype(jnp.float32)
    t = t_ref[...].astype(jnp.float32)

    if ragged:
        # Last feature tile overhangs D: zero out-of-range lanes. The predicate
        # is all-true for every non-last tile, so this is exact everywhere.
        col = k * tile_d + lax.broadcasted_iota(jnp.int32, x.shape, 1)
        valid = col < d_total
        zero = jnp.float32(0.0)
        x = jnp.where(valid, x, zero)
        t = jnp.where(valid, t, zero)

    xt_part = jnp.sum(x * t, axis=1, keepdims=True)   # (S, 1) f32
    s_part = jnp.sum(x + t, axis=1, keepdims=True)    # (S, 1) f32

    @pl.when(k == 0)
    def _init():
        acc_xt_ref[...] = xt_part
        acc_s_ref[...] = s_part

    @pl.when(k > 0)
    def _accumulate():
        acc_xt_ref[...] += xt_part
        acc_s_ref[...] += s_part

    @pl.when(k == nk - 1)
    def _finalize():
        smooth = jnp.float32(1.0)
        o_ref[...] = 2.0 * (acc_xt_ref[...] + smooth) / (acc_s_ref[...] + smooth)


def _choose_tiling(n, d, itemsize):
    """Pick (samples_per_block S, feature_tile TILE_D); block ~<= 2 MiB."""
    budget_elems = max(1024, _BLOCK_BUDGET_BYTES // itemsize)
    # VMEM pads the sublane (row) dim of a block to a multiple of 8, so when
    # fewer than 8 rows are live, budget the padded footprint (8 * TILE_D).
    per_row = max(128, budget_elems // 8)
    if n <= 8:
        s = n  # block batch dim == full array dim (allowed for any n)
        tile_d = d if d <= per_row else max(128, _round_down(per_row, 128))
    else:
        if d <= per_row:
            # Small per-sample feature count: fold many samples per grid step.
            s_budget = max(8, _round_down(budget_elems // max(d, 1), 8))
            s = min(s_budget, _round_down(n, 8))
            n_blocks = _cdiv(n, s)
            # Re-balance so the last batch block wastes < 8 rows.
            s = min(s, max(8, _round_up(_cdiv(n, n_blocks), 8)))
            tile_d = d
        else:
            s = 8
            tile_d = max(128, _round_down(per_row, 128))
    return s, tile_d


def _dice_ratios_pallas(x2d, t2d, s, tile_d):
    """Per-sample dice ratios 2*(inter+1)/(sum_x+sum_t+1) via pallas_call."""
    n, d = x2d.shape
    k_steps = _cdiv(d, tile_d)
    n_blocks = _cdiv(n, s)
    ragged = (d % tile_d) != 0

    kernel = functools.partial(_dice_kernel, tile_d=tile_d, d_total=d,
                               ragged=ragged)

    out = pl.pallas_call(
        kernel,
        out_shape=jax.ShapeDtypeStruct((n, 1), jnp.float32),
        grid=(n_blocks, k_steps),
        in_specs=[
            pl.BlockSpec((s, tile_d), lambda i, k: (i, k)),
            pl.BlockSpec((s, tile_d), lambda i, k: (i, k)),
        ],
        out_specs=pl.BlockSpec((s, 1), lambda i, k: (i, 0)),
        scratch_shapes=[
            pltpu.VMEM((s, 1), jnp.float32),
            pltpu.VMEM((s, 1), jnp.float32),
        ],
        compiler_params=pltpu.CompilerParams(
            dimension_semantics=("parallel", "arbitrary"),
            vmem_limit_bytes=48 * 1024 * 1024,
        ),
    )(x2d, t2d)
    return out[:, 0]


@jax.jit
def dice_loss(inputs, target):
    """Pallas TPU implementation of DiceLoss.forward (scalar f32)."""
    n = target.shape[0]
    x2d = inputs.reshape(n, -1)
    t2d = target.reshape(n, -1)
    d = x2d.shape[1]
    itemsize = max(jnp.dtype(x2d.dtype).itemsize, jnp.dtype(t2d.dtype).itemsize)

    s, tile_d = _choose_tiling(n, d, itemsize)
    ratios = _dice_ratios_pallas(x2d, t2d, s, tile_d)
    return (jnp.float32(1.0) - jnp.sum(ratios) / n).astype(jnp.float32)


@functools.partial(jax.jit, static_argnums=(2, 3))
def _dice_loss_forced(inputs, target, s, tile_d):
    """Same loss but with a forced tiling (exercises ragged/multi-k path)."""
    n = target.shape[0]
    ratios = _dice_ratios_pallas(inputs.reshape(n, -1), target.reshape(n, -1),
                                 s, tile_d)
    return (jnp.float32(1.0) - jnp.sum(ratios) / n).astype(jnp.float32)


def _dice_loss_ref(inputs, target):
    # Pure-JAX reference mirroring the PyTorch module exactly.
    n = target.shape[0]
    smooth = 1.0
    x = inputs.reshape(n, -1).astype(jnp.float32)
    t = target.reshape(n, -1).astype(jnp.float32)
    inter = jnp.sum(x * t, axis=1)
    loss = 2.0 * (inter + smooth) / (jnp.sum(x, axis=1) + jnp.sum(t, axis=1) + smooth)
    return 1.0 - jnp.sum(loss) / n


if __name__ == "__main__":
    key = jax.random.PRNGKey(0)
    k1, k2, k3, k4 = jax.random.split(key, 4)

    # Small segmentation-style inputs: (N, C, H, W) = (2, 4, 16, 16).
    x = jax.nn.sigmoid(jax.random.normal(k1, (2, 4, 16, 16), dtype=jnp.float32))
    y = (jax.random.uniform(k2, (2, 4, 16, 16)) > 0.5).astype(jnp.float32)

    loss = jax.block_until_ready(dice_loss(x, y))
    ref = _dice_loss_ref(x, y)
    assert jnp.allclose(loss, ref, atol=1e-5, rtol=1e-5), (loss, ref)

    # Second check: ragged feature dim + multi-tile reduction path
    # (D = 300, forced TILE_D = 128 -> 3 k-steps, last tile masked).
    x2 = jax.nn.sigmoid(jax.random.normal(k3, (2, 3, 10, 10), dtype=jnp.float32))
    y2 = (jax.random.uniform(k4, (2, 3, 10, 10)) > 0.5).astype(jnp.float32)
    loss2 = jax.block_until_ready(_dice_loss_forced(x2, y2, 2, 128))
    ref2 = _dice_loss_ref(x2, y2)
    assert jnp.allclose(loss2, ref2, atol=1e-5, rtol=1e-5), (loss2, ref2)

    print("KERNEL_OK")
</pallas_src>

<mosaic_0001>
module attributes {stable_mosaic.version = 11 : i64} {
  func.func @_dice_kernel(%arg0: i32, %arg1: i32, %arg2: memref<2x1024xf32, #tpu.memory_space<vmem>>, %arg3: memref<2x1024xf32, #tpu.memory_space<vmem>>, %arg4: memref<2x1xf32, #tpu.memory_space<vmem>>, %arg5: memref<2x1xf32, #tpu.memory_space<vmem>>, %arg6: memref<2x1xf32, #tpu.memory_space<vmem>>) attributes {dimension_semantics = [#tpu.dimension_semantics<parallel>, #tpu.dimension_semantics<arbitrary>], iteration_bounds = array<i64: 1, 1>, scalar_prefetch = 0 : i64, scratch_operands = 2 : i64, tpu.core_type = #tpu.core_type<tc>, window_params = [{transform_indices = @transform_0, window_bounds = array<i64: 2, 1024>}, {transform_indices = @transform_1, window_bounds = array<i64: 2, 1024>}, {transform_indices = @transform_2, window_bounds = array<i64: 2, 1>}]} {
    %c0 = arith.constant 0 : index
    %c0_0 = arith.constant 0 : index
    %0 = vector.load %arg2[%c0, %c0_0] : memref<2x1024xf32, #tpu.memory_space<vmem>>, vector<2x1024xf32>
    %c0_1 = arith.constant 0 : index
    %c0_2 = arith.constant 0 : index
    %1 = vector.load %arg3[%c0_1, %c0_2] : memref<2x1024xf32, #tpu.memory_space<vmem>>, vector<2x1024xf32>
    %2 = arith.mulf %0, %1 : vector<2x1024xf32>
    %cst = arith.constant dense<0.000000e+00> : vector<2xf32>
    %3 = vector.multi_reduction <add>, %2, %cst [1] : vector<2x1024xf32> to vector<2xf32>
    %4 = vector.shape_cast %3 : vector<2xf32> to vector<2x1xf32>
    %5 = arith.addf %0, %1 : vector<2x1024xf32>
    %cst_3 = arith.constant dense<0.000000e+00> : vector<2xf32>
    %6 = vector.multi_reduction <add>, %5, %cst_3 [1] : vector<2x1024xf32> to vector<2xf32>
    %7 = vector.shape_cast %6 : vector<2xf32> to vector<2x1xf32>
    %c0_i32 = arith.constant 0 : i32
    %8 = arith.cmpi eq, %arg1, %c0_i32 : i32
    %9 = arith.extui %8 : i1 to i32
    %c0_i32_4 = arith.constant 0 : i32
    %10 = arith.cmpi ne, %9, %c0_i32_4 : i32
    scf.if %10 {
      %c0_9 = arith.constant 0 : index
      %c0_10 = arith.constant 0 : index
      %17 = vector.load %arg5[%c0_9, %c0_10] : memref<2x1xf32, #tpu.memory_space<vmem>>, vector<2x1xf32>
      tpu.vector_store %arg5[%c0_9, %c0_10], %4 {strides = array<i32>} : memref<2x1xf32, #tpu.memory_space<vmem>>, vector<2x1xf32>,
      %c0_11 = arith.constant 0 : index
      %c0_12 = arith.constant 0 : index
      %18 = vector.load %arg6[%c0_11, %c0_12] : memref<2x1xf32, #tpu.memory_space<vmem>>, vector<2x1xf32>
      tpu.vector_store %arg6[%c0_11, %c0_12], %7 {strides = array<i32>} : memref<2x1xf32, #tpu.memory_space<vmem>>, vector<2x1xf32>,
    } else {
    }
    %c0_i32_5 = arith.constant 0 : i32
    %11 = arith.cmpi sgt, %arg1, %c0_i32_5 : i32
    %12 = arith.extui %11 : i1 to i32
    %c0_i32_6 = arith.constant 0 : i32
    %13 = arith.cmpi ne, %12, %c0_i32_6 : i32
    scf.if %13 {
      %c0_9 = arith.constant 0 : index
      %c0_10 = arith.constant 0 : index
      %17 = vector.load %arg5[%c0_9, %c0_10] : memref<2x1xf32, #tpu.memory_space<vmem>>, vector<2x1xf32>
      %18 = arith.addf %17, %4 : vector<2x1xf32>
      %c0_11 = arith.constant 0 : index
      %c0_12 = arith.constant 0 : index
      %19 = vector.load %arg5[%c0_11, %c0_12] : memref<2x1xf32, #tpu.memory_space<vmem>>, vector<2x1xf32>
      tpu.vector_store %arg5[%c0_11, %c0_12], %18 {strides = array<i32>} : memref<2x1xf32, #tpu.memory_space<vmem>>, vector<2x1xf32>,
      %c0_13 = arith.constant 0 : index
      %c0_14 = arith.constant 0 : index
      %20 = vector.load %arg6[%c0_13, %c0_14] : memref<2x1xf32, #tpu.memory_space<vmem>>, vector<2x1xf32>
      %21 = arith.addf %20, %7 : vector<2x1xf32>
      %c0_15 = arith.constant 0 : index
      %c0_16 = arith.constant 0 : index
      %22 = vector.load %arg6[%c0_15, %c0_16] : memref<2x1xf32, #tpu.memory_space<vmem>>, vector<2x1xf32>
      tpu.vector_store %arg6[%c0_15, %c0_16], %21 {strides = array<i32>} : memref<2x1xf32, #tpu.memory_space<vmem>>, vector<2x1xf32>,
    } else {
    }
    %c0_i32_7 = arith.constant 0 : i32
    %14 = arith.cmpi eq, %arg1, %c0_i32_7 : i32
    %15 = arith.extui %14 : i1 to i32
    %c0_i32_8 = arith.constant 0 : i32
    %16 = arith.cmpi ne, %15, %c0_i32_8 : i32
    scf.if %16 {
      %c0_9 = arith.constant 0 : index
      %c0_10 = arith.constant 0 : index
      %17 = vector.load %arg5[%c0_9, %c0_10] : memref<2x1xf32, #tpu.memory_space<vmem>>, vector<2x1xf32>
      %cst_11 = arith.constant 1.000000e+00 : f32
      %18 = vector.broadcast %cst_11 : f32 to vector<2x1xf32>
      %19 = arith.addf %17, %18 : vector<2x1xf32>
      %cst_12 = arith.constant 2.000000e+00 : f32
      %20 = vector.broadcast %cst_12 : f32 to vector<2x1xf32>
      %21 = arith.mulf %20, %19 : vector<2x1xf32>
      %c0_13 = arith.constant 0 : index
      %c0_14 = arith.constant 0 : index
      %22 = vector.load %arg6[%c0_13, %c0_14] : memref<2x1xf32, #tpu.memory_space<vmem>>, vector<2x1xf32>
      %cst_15 = arith.constant 1.000000e+00 : f32
      %23 = vector.broadcast %cst_15 : f32 to vector<2x1xf32>
      %24 = arith.addf %22, %23 : vector<2x1xf32>
      %25 = arith.divf %21, %24 : vector<2x1xf32>
      %c0_16 = arith.constant 0 : index
      %c0_17 = arith.constant 0 : index
      %26 = vector.load %arg4[%c0_16, %c0_17] : memref<2x1xf32, #tpu.memory_space<vmem>>, vector<2x1xf32>
      tpu.vector_store %arg4[%c0_16, %c0_17], %25 {strides = array<i32>} : memref<2x1xf32, #tpu.memory_space<vmem>>, vector<2x1xf32>,
    } else {
    }
    return
  }
  func.func @transform_0(%arg0: i32, %arg1: i32) -> (i32, i32) {
    %c0_i32 = arith.constant 0 : i32
    return %arg0, %arg1 : i32, i32
  }
  func.func @transform_1(%arg0: i32, %arg1: i32) -> (i32, i32) {
    %c0_i32 = arith.constant 0 : i32
    return %arg0, %arg1 : i32, i32
  }
  func.func @transform_2(%arg0: i32, %arg1: i32) -> (i32, i32) {
    %c0_i32 = arith.constant 0 : i32
    %c0_i32_0 = arith.constant 0 : i32
    return %arg0, %c0_i32 : i32, i32
  }
}

</mosaic_0001>

<bundles_post_ra>
// kernel: dice_loss.1
= control target key start
LH: loop header
LB: loop body
LE: loop exit
PB: predicated region body
PF: predicated region fallthrough
CT: control target
= control target key end

     0   :  { %vm38_vm0 = vcmask 1041408   ;;  %vm100_vm1 = vcmask 1024   ;;  %s194_s0 = inlined_call_operand.vmem [shape: f32[2,1024], index: 0, kind: input, shape index: {}]   ;;  %s195_s1 = inlined_call_operand.vmem [shape: f32[2,1024], index: 1, kind: input, shape index: {}]   ;;  %s196_s2 = inlined_call_operand.vmem [shape: f32[2,1], index: 2, kind: output, shape index: {}]  }
   0x1   :  { %v11_v0 = vld [vmem:[%s194_s0] sm:$0xff]  ;;  %v12_v1 = vld [vmem:[%s194_s0 + $0x8] sm:$0xff] }
   0x2   :  { %v13_v2 = vld [vmem:[%s195_s1] sm:$0xff]  ;;  %v14_v3 = vld [vmem:[%s195_s1 + $0x8] sm:$0xff] }
   0x3   :  { %v15_v4 = vmul.f32 %v13_v2, %v11_v0  ;;  %v16_v5 = vmul.f32 %v14_v3, %v12_v1  ;;  %v56_v8 = vadd.f32 %v13_v2, %v11_v0  ;;  %v57_v11 = vadd.f32 %v14_v3, %v12_v1 }
   0x5   :  { %19 = vst [vmem:[#allocation1] ss:$4 sm:$0xff] %v15_v4 }
   0x6   :  { %21 = vst [vmem:[#allocation1 + $0x20] ss:$4 sm:$0xff] %v16_v5 }
   0xc   :  { %v22_v6 = vld.sshfl [vmem:[#allocation1] sm:$0xff pattern:$0x73625140]  ;;  %v23_v7 = vld.sshfl [vmem:[#allocation1 + $0x8] sm:$0xff pattern:$0x73625140] }
   0xd   :  { %v24_v9 = vld.sshfl [vmem:[#allocation1 + $0x10] sm:$0xff pattern:$0x73625140]  ;;  %v25_v10 = vld.sshfl [vmem:[#allocation1 + $0x18] sm:$0xff pattern:$0x73625140] }
   0xe   :  { %v26_v12 = vld.sshfl [vmem:[#allocation1 + $0x20] sm:$0xff pattern:$0x73625140]  ;;  %v27_v13 = vld.sshfl [vmem:[#allocation1 + $0x28] sm:$0xff pattern:$0x73625140] }
   0xf   :  { %v28_v14 = vld.sshfl [vmem:[#allocation1 + $0x30] sm:$0xff pattern:$0x73625140]  ;;  %v29_v15 = vld.sshfl [vmem:[#allocation1 + $0x38] sm:$0xff pattern:$0x73625140] }
  0x10   :  { %60 = vst [vmem:[#allocation1] ss:$4 sm:$0xff] %v56_v8  ;;  %v39_v16 = vsel %vm38_vm0, %v22_v6, 0.0  ;;  %v40_v17 = vsel %vm38_vm0, %v23_v7, 0.0  ;;  %v42_v20 = vsel %vm38_vm0, %v24_v9, 0.0  ;;  %v44_v28 = vsel %vm38_vm0, %v25_v10, 0.0 }
  0x11   :  { %62 = vst [vmem:[#allocation1 + $0x20] ss:$4 sm:$0xff] %v57_v11  ;;  %v41_v18 = vadd.f32 %v40_v17, %v39_v16  ;;  %v46_v36 = vsel %vm38_vm0, %v26_v12, 0.0  ;;  %v48_v44 = vsel %vm38_vm0, %v27_v13, 0.0  ;;  %v50_v49 = vsel %vm38_vm0, %v28_v14, 0.0 }
  0x12   :  { %v52_v52 = vsel %vm38_vm0, %v29_v15, 0.0 }
  0x13   :  { %v43_v24 = vadd.f32 %v42_v20, %v41_v18 }
  0x15   :  { %v45_v34 = vadd.f32 %v44_v28, %v43_v24 }
  0x17   :  { %v63_v19 = vld.sshfl [vmem:[#allocation1] sm:$0xff pattern:$0x73625140]  ;;  %v64_v21 = vld.sshfl [vmem:[#allocation1 + $0x8] sm:$0xff pattern:$0x73625140]  ;;  %v47_v42 = vadd.f32 %v46_v36, %v45_v34 }
  0x18   :  { %v65_v22 = vld.sshfl [vmem:[#allocation1 + $0x10] sm:$0xff pattern:$0x73625140]  ;;  %v66_v23 = vld.sshfl [vmem:[#allocation1 + $0x18] sm:$0xff pattern:$0x73625140] }
  0x19   :  { %v79_v25 = vsel %vm38_vm0, %v63_v19, 0.0  ;;  %v80_v26 = vsel %vm38_vm0, %v64_v21, 0.0  ;;  %v82_v27 = vsel %vm38_vm0, %v65_v22, 0.0  ;;  %v67_v29 = vld.sshfl [vmem:[#allocation1 + $0x20] sm:$0xff pattern:$0x73625140]  ;;  %v49_v48 = vadd.f32 %v48_v44, %v47_v42 }
  0x1a   :  { %v81_v30 = vadd.f32 %v80_v26, %v79_v25  ;;  %v84_v31 = vsel %vm38_vm0, %v66_v23, 0.0  ;;  %v68_v32 = vld.sshfl [vmem:[#allocation1 + $0x28] sm:$0xff pattern:$0x73625140]  ;;  %v86_v35 = vsel %vm38_vm0, %v67_v29, 0.0 }
  0x1b   :  { %v69_v37 = vld.sshfl [vmem:[#allocation1 + $0x30] sm:$0xff pattern:$0x73625140]  ;;  %v88_v39 = vsel %vm38_vm0, %v68_v32, 0.0  ;;  %v51_v51 = vadd.f32 %v50_v49, %v49_v48 }
  0x1c   :  { %v83_v33 = vadd.f32 %v82_v27, %v81_v30  ;;  %v70_v40 = vld.sshfl [vmem:[#allocation1 + $0x38] sm:$0xff pattern:$0x73625140]  ;;  %v90_v43 = vsel %vm38_vm0, %v69_v37, 0.0 }
  0x1d   :  { %v92_v46 = vsel %vm38_vm0, %v70_v40, 0.0  ;;  %v53_v53 = vadd.f32 %v52_v52, %v51_v51 }
  0x1e   :  { %v85_v38 = vadd.f32 %v84_v31, %v83_v33 }
  0x20   :  { %v87_v41 = vadd.f32 %v86_v35, %v85_v38 }
  0x22   :  { %v89_v45 = vadd.f32 %v88_v39, %v87_v41 }
  0x24   :  { %v91_v47 = vadd.f32 %v90_v43, %v89_v45 }
  0x26   :  { %v93_v50 = vadd.f32 %v92_v46, %v91_v47 }
  0x28   :  { %94 = vadd.xlane.f32.xlu0 %v93_v50 }
  0x30   :  { %54 = vadd.xlane.f32.xlu0 %v53_v53 }
  0x9b   :  { %v95_v54 = vpop.xlane.xlu0 %94 }
  0x9c   :  { %102 = vst.msk [vmem:[#allocation3] sm:$0x3] %vm100_vm1, %v95_v54 }
  0xa3   :  { %v120_v55 = vld [vmem:[#allocation3] sm:$0x3]  ;;  %v55_v56 = vpop.xlane.xlu0 %54 }
  0xa4   :  { %v121_v57 = vadd.f32 1.0, %v120_v55  ;;  %101 = vst.msk [vmem:[#allocation2] sm:$0x3] %vm100_vm1, %v55_v56 }
  0xa6   :  { %143 = vrcp.f32 %v121_v57  ;;  %v133_v63 = vand.u32 2147483648, %v121_v57  ;;  %v131_v1 = vand.u32 2147483647, %v121_v57  ;;  %vm127_vm3 = vweird.f32 %v121_v57 }
  0xa8   :  { %v134_v4 = vor.u32 1.1754944e-38, %v133_v63  ;;  %vm132_vm5 = vcmp.eq.f32.partialorder %v131_v1, 8.507059e+37 }
  0xab   :  { %v117_v59 = vld [vmem:[#allocation2] sm:$0x3] }
  0xac   :  { %v144_v58 = vpop.eup %143  ;;  %v118_v62 = vadd.f32 1.0, %v117_v59 }
  0xad   :  { %v123_v60 = vmul.f32 %v144_v58, %v121_v57  ;;  %vm128_vm2 = vweird.f32 %v144_v58 }
  0xae   :  { %v119_v3 = vmul.f32 2.0, %v118_v62  ;;  %vm129_vm4 = vmor %vm127_vm3, %vm128_vm2 }
  0xaf   :  { %v124_v61 = vsub.f32 1.0, %v123_v60 }
  0xb1   :  { %v125_v0 = vmul.f32 %v144_v58, %v124_v61 }
  0xb3   :  { %v126_v2 = vadd.f32 %v144_v58, %v125_v0 }
  0xb5   :  { %v130_v5 = vsel %vm129_vm4, %v144_v58, %v126_v2 }
  0xb6   :  { %v135_v6 = vsel %vm132_vm5, %v134_v4, %v130_v5 }
  0xb7   :  { %v136_v7 = vmul.f32 %v135_v6, %v119_v3 }
  0xb9   :  { %138 = vst.msk [vmem:[%s196_s2] sm:$0x3] %vm100_vm1, %v136_v7 }

</bundles_post_ra>
